<compile_context>
chip_gen: v6e
topology: v6e:2x2x1
jax: 0.10.0
libtpu: 0.0.40
codegen_flags: <defaults>
</compile_context>

<pallas_src>
from functools import partial

import jax
import jax.numpy as jnp
from jax import lax
from jax.experimental import pallas as pl
from jax.experimental.pallas import tpu as pltpu

_MODE_GRANULE = 8   # mode-axis padding granule (fixed once in __init__)
_LANE = 128         # lane width: output columns padded to a multiple of this
_SUBLANE = 8        # batch padded to a multiple of this in the fused slab build


def _spectral_mul_kernel(x_ref, w_ref, o_ref):
    # x_ref: (TM, B_pad, 2*Cin)        bf16, [xr | xi] per mode
    # w_ref: (TM, 2*Cin, Cout2_pad)    bf16, block-form complex weights per mode
    # o_ref: (TM, B_pad, Cout2_pad)    f32,  [re | im | 0-pad] per mode
    o_ref[...] = lax.dot_general(
        x_ref[...], w_ref[...],
        dimension_numbers=(((2,), (1,)), ((0,), (0,))),  # batched over modes
        preferred_element_type=jnp.float32,
    ).astype(o_ref.dtype)


def _choose_tm(m_pad, bytes_per_mode, step_bytes=2 * 1024 * 1024, min_steps=8):
    """Largest divisor of m_pad with <= ~2 MiB per step and >= min(8, m_pad) steps."""
    target_steps = min(min_steps, m_pad)
    tm = 1
    for cand in range(1, m_pad + 1):
        if m_pad % cand != 0:
            continue
        if cand * bytes_per_mode > step_bytes:
            continue
        if m_pad // cand < target_steps:
            continue
        tm = cand
    return tm


def _compl_mul1d_pallas(x_blk, w_blk):
    """x_blk: (M_pad, B_pad, 2*Cin) bf16; w_blk: (M_pad, 2*Cin, Cout2_pad) bf16
       -> (M_pad, B_pad, Cout2_pad) f32."""
    m_pad, b_pad, two_cin = x_blk.shape
    cout2 = w_blk.shape[-1]

    bytes_per_mode = (x_blk.dtype.itemsize * b_pad * two_cin
                      + w_blk.dtype.itemsize * two_cin * cout2
                      + 4 * b_pad * cout2)
    tm = _choose_tm(m_pad, bytes_per_mode)

    grid_spec = pltpu.PrefetchScalarGridSpec(
        num_scalar_prefetch=0,
        grid=(m_pad // tm,),
        in_specs=[
            pl.BlockSpec((tm, b_pad, two_cin), lambda m: (m, 0, 0)),
            pl.BlockSpec((tm, two_cin, cout2), lambda m: (m, 0, 0)),
        ],
        out_specs=pl.BlockSpec((tm, b_pad, cout2), lambda m: (m, 0, 0)),
    )

    return pl.pallas_call(
        _spectral_mul_kernel,
        out_shape=jax.ShapeDtypeStruct((m_pad, b_pad, cout2), jnp.float32),
        grid_spec=grid_spec,
        compiler_params=pltpu.CompilerParams(
            dimension_semantics=("parallel",),     # modes shard across TCs on v7x
            vmem_limit_bytes=32 * 1024 * 1024,     # safe on v7x's 64 MiB VMEM
        ),
    )(x_blk, w_blk)


@partial(jax.jit, static_argnames=("modes1", "out_channels"))
def _spectral_conv1d_fwd(x, w_blk, *, modes1, out_channels):
    B, Cin, N = x.shape
    n_half = N // 2 + 1
    M = min(modes1, n_half)
    Cout = out_channels
    M_pad = w_blk.shape[0]
    B_pad = pl.cdiv(B, _SUBLANE) * _SUBLANE

    x_ft = jnp.fft.rfft(x, axis=-1)                       # (B, Cin, N//2+1) c64
    xm = jnp.transpose(x_ft[:, :, :M], (2, 0, 1))         # (M, B, Cin) complex
    # Single real slab [xr | xi]; transpose/concat/pad all fuse under jit.
    x_blk = jnp.concatenate([jnp.real(xm), jnp.imag(xm)], axis=-1)  # (M, B, 2Cin)
    x_blk = jnp.pad(x_blk, ((0, M_pad - M), (0, B_pad - B), (0, 0)))
    x_blk = x_blk.astype(w_blk.dtype)                     # bf16 operands

    out_blk = _compl_mul1d_pallas(x_blk, w_blk)           # (M_pad, B_pad, C2p) f32

    out_m = lax.complex(out_blk[:M, :B, :Cout],
                        out_blk[:M, :B, Cout:2 * Cout])   # (M, B, Cout) c64
    out_m = jnp.transpose(out_m, (1, 2, 0))               # (B, Cout, M)
    out_ft = lax.pad(out_m, jnp.zeros((), out_m.dtype),
                     ((0, 0, 0), (0, 0, 0), (0, n_half - M, 0)))
    return jnp.fft.irfft(out_ft, n=N, axis=-1)            # (B, Cout, N) f32


class SpectralConv1d:
    """JAX/Pallas port of the PyTorch SpectralConv1d module (forward only)."""

    def __init__(self, in_channels, out_channels, modes1, key,
                 compute_dtype=jnp.bfloat16):
        self.in_channels = in_channels
        self.out_channels = out_channels
        self.modes1 = modes1
        self.scale = 1.0 / (in_channels * out_channels)
        kr, ki = jax.random.split(key)
        # torch.rand with dtype=cfloat: real & imag each uniform in [0, 1)
        self.w_real = self.scale * jax.random.uniform(
            kr, (in_channels, out_channels, modes1), dtype=jnp.float32)
        self.w_imag = self.scale * jax.random.uniform(
            ki, (in_channels, out_channels, modes1), dtype=jnp.float32)

        # Precompute mode-major block-form weights ONCE:
        #   W_blk[m] = [[wr_m, wi_m], [-wi_m, wr_m]]  of shape (2*Cin, 2*Cout)
        # so that [xr | xi] @ W_blk[m] = [re | im] of the complex product.
        wr = jnp.transpose(self.w_real, (2, 0, 1))          # (M, Cin, Cout)
        wi = jnp.transpose(self.w_imag, (2, 0, 1))          # (M, Cin, Cout)
        top = jnp.concatenate([wr, wi], axis=-1)            # (M, Cin, 2*Cout)
        bot = jnp.concatenate([-wi, wr], axis=-1)           # (M, Cin, 2*Cout)
        w_blk = jnp.concatenate([top, bot], axis=1)         # (M, 2*Cin, 2*Cout)
        # Pad once: mode axis -> multiple of the grid granule (even tiling, no
        # per-call padding), output columns -> multiple of 128 (lane-dense stores).
        m_pad = pl.cdiv(modes1, _MODE_GRANULE) * _MODE_GRANULE
        cout2_pad = pl.cdiv(2 * out_channels, _LANE) * _LANE
        w_blk = jnp.pad(w_blk, ((0, m_pad - modes1), (0, 0),
                                (0, cout2_pad - 2 * out_channels)))
        self.w_blk = w_blk.astype(jnp.dtype(compute_dtype))

    def __call__(self, x):
        # x: [B, Cin, N] float32 -> [B, Cout, N] float32
        return _spectral_conv1d_fwd(x, self.w_blk,
                                    modes1=self.modes1,
                                    out_channels=self.out_channels)


if __name__ == "__main__":
    key = jax.random.PRNGKey(0)
    k_x, k_w = jax.random.split(key)

    B, Cin, Cout, N, modes1 = 2, 4, 4, 16, 8
    x = jax.random.normal(k_x, (B, Cin, N), dtype=jnp.float32)

    layer = SpectralConv1d(Cin, Cout, modes1, k_w)
    out = jax.block_until_ready(layer(x))

    # Pure-JAX f32 reference of the full forward (kernel uses bf16 operands with
    # f32 accumulate, so compare with a bf16-appropriate tolerance).
    x_ft = jnp.fft.rfft(x, axis=-1)
    w = layer.w_real + 1j * layer.w_imag
    ref_m = jnp.einsum('bix,iox->box', x_ft[:, :, :modes1], w)
    ref_ft = jnp.zeros((B, Cout, N // 2 + 1), dtype=jnp.complex64)
    ref_ft = ref_ft.at[:, :, :modes1].set(ref_m)
    ref = jnp.fft.irfft(ref_ft, n=N, axis=-1)

    assert out.shape == (B, Cout, N)
    rel_err = jnp.linalg.norm(out - ref) / jnp.linalg.norm(ref)
    assert float(rel_err) < 2e-2, f"relative error too large: {float(rel_err)}"

    print("KERNEL_OK")
</pallas_src>

<mosaic_0001>
module attributes {stable_mosaic.version = 11 : i64} {
  func.func @_spectral_mul_kernel(%arg0: i32, %arg1: memref<1x8x8xbf16, #tpu.memory_space<vmem>>, %arg2: memref<1x8x128xbf16, #tpu.memory_space<vmem>>, %arg3: memref<1x8x128xf32, #tpu.memory_space<vmem>>) attributes {dimension_semantics = [#tpu.dimension_semantics<parallel>], iteration_bounds = array<i64: 8>, scalar_prefetch = 0 : i64, scratch_operands = 0 : i64, tpu.core_type = #tpu.core_type<tc>, window_params = [{transform_indices = @transform_0, window_bounds = array<i64: 1, 8, 8>}, {transform_indices = @transform_1, window_bounds = array<i64: 1, 8, 128>}, {transform_indices = @transform_2, window_bounds = array<i64: 1, 8, 128>}]} {
    %c0 = arith.constant 0 : index
    %c0_0 = arith.constant 0 : index
    %c0_1 = arith.constant 0 : index
    %0 = vector.load %arg1[%c0, %c0_0, %c0_1] : memref<1x8x8xbf16, #tpu.memory_space<vmem>>, vector<1x8x8xbf16>
    %c0_2 = arith.constant 0 : index
    %c0_3 = arith.constant 0 : index
    %c0_4 = arith.constant 0 : index
    %1 = vector.load %arg2[%c0_2, %c0_3, %c0_4] : memref<1x8x128xbf16, #tpu.memory_space<vmem>>, vector<1x8x128xbf16>
    %cst = arith.constant dense<0.000000e+00> : vector<1x8x128xf32>
    %2 = tpu.matmul %0, %1, %cst {dimension_numbers = #tpu.dot_dimension_numbers<[2], [1], [1], [2], [0, 0, 0, 1, 1, 2], [0], [0]>} : vector<1x8x8xbf16>, vector<1x8x128xbf16>, vector<1x8x128xf32> -> vector<1x8x128xf32>
    %c0_5 = arith.constant 0 : index
    %c0_6 = arith.constant 0 : index
    %c0_7 = arith.constant 0 : index
    %3 = vector.load %arg3[%c0_5, %c0_6, %c0_7] : memref<1x8x128xf32, #tpu.memory_space<vmem>>, vector<1x8x128xf32>
    tpu.vector_store %arg3[%c0_5, %c0_6, %c0_7], %2 {strides = array<i32>} : memref<1x8x128xf32, #tpu.memory_space<vmem>>, vector<1x8x128xf32>,
    return
  }
  func.func @transform_0(%arg0: i32) -> (i32, i32, i32) {
    %c0_i32 = arith.constant 0 : i32
    %c0_i32_0 = arith.constant 0 : i32
    %c0_i32_1 = arith.constant 0 : i32
    return %arg0, %c0_i32, %c0_i32_0 : i32, i32, i32
  }
  func.func @transform_1(%arg0: i32) -> (i32, i32, i32) {
    %c0_i32 = arith.constant 0 : i32
    %c0_i32_0 = arith.constant 0 : i32
    %c0_i32_1 = arith.constant 0 : i32
    return %arg0, %c0_i32, %c0_i32_0 : i32, i32, i32
  }
  func.func @transform_2(%arg0: i32) -> (i32, i32, i32) {
    %c0_i32 = arith.constant 0 : i32
    %c0_i32_0 = arith.constant 0 : i32
    %c0_i32_1 = arith.constant 0 : i32
    return %arg0, %c0_i32, %c0_i32_0 : i32, i32, i32
  }
}

</mosaic_0001>

<bundles_post_ra>
// kernel: reverse.1
= control target key start
LH: loop header
LB: loop body
LE: loop exit
PB: predicated region body
PF: predicated region fallthrough
CT: control target
= control target key end

     0   :  { %s92_s0 = inlined_call_operand.vmem [shape: f32[2,4,7], index: 0, kind: input, shape index: {}]   ;;  %s93_s1 = inlined_call_operand.vmem [shape: f32[2,4,7], index: 1, kind: output, shape index: {}]  }
   0x1   :  { %v28_v0 = vld [vmem:[%s92_s0 + $0xc] sm:$0x3]  ;;  %v29_v1 = vld [vmem:[%s92_s0 + $0xa] sm:$0x3]  ;;  %v31_v2 = vld [vmem:[%s92_s0 + $0x8] sm:$0x3] }
   0x2   :  { %4 = vst [vmem:[%s93_s1] sm:$0x3] %v28_v0  ;;  %30 = vst [vmem:[%s93_s1 + $0x2] sm:$0x3] %v29_v1  ;;  %v33_v3 = vld [vmem:[%s92_s0 + $0x6] sm:$0x3] }
   0x3   :  { %32 = vst [vmem:[%s93_s1 + $0x4] sm:$0x3] %v31_v2  ;;  %v35_v4 = vld [vmem:[%s92_s0 + $0x4] sm:$0x3]  ;;  %v37_v5 = vld [vmem:[%s92_s0 + $0x2] sm:$0x3] }
   0x4   :  { %34 = vst [vmem:[%s93_s1 + $0x6] sm:$0x3] %v33_v3  ;;  %36 = vst [vmem:[%s93_s1 + $0x8] sm:$0x3] %v35_v4  ;;  %v25_v6 = vld [vmem:[%s92_s0] sm:$0x3] }
   0x5   :  { %38 = vst [vmem:[%s93_s1 + $0xa] sm:$0x3] %v37_v5  ;;  %39 = vst [vmem:[%s93_s1 + $0xc] sm:$0x3] %v25_v6 }

// kernel: _spectral_conv1d_fwd.1
= control target key start
LH: loop header
LB: loop body
LE: loop exit
PB: predicated region body
PF: predicated region fallthrough
CT: control target
= control target key end

     0   :  { %s327_s9 = smov 0   ;;  %s347_s0 = inlined_call_operand.vmem [shape: bf16[8,8,8], index: 0, kind: input, shape index: {}]   ;;  %s348_s1 = inlined_call_operand.vmem [shape: bf16[8,8,128], index: 1, kind: input, shape index: {}]   ;;  %s349_s2 = inlined_call_operand.vmem [shape: f32[8,8,128], index: 2, kind: output, shape index: {}]  }
   0x1 LB: > { %s273_s10 = sadd.s32 4294967295, %s308_s9   ;;  %p277_p0 = scmp.ge.s32.totalorder %s308_s9, 1  ;;  %s308_s9 = sphi %s327_s9, %s12_s9  }
   0x2   : > { %p120_p1 = scmp.lt.s32.totalorder %s308_s9, 9 }
   0x4   : > { %p121_p2 = pnand %p277_p0, %p120_p1 }
   0x5   : > { %p144_p3 = scmp.lt.s32.totalorder (!%p121_p2), %s273_s10, 7 }
   0x6   : > { %124 = sbr.rel (%p121_p2) target bundleno = 218 (0xda), region = 28 }
   0xb   : > { %v310_v0 = vmov 0.0   ;;  %vm311_vm0 = vmmov 0   ;;  %s351_s10 = smov (!%p144_p3, %s273_s10), 7  ;;  %vm163_vm1 = vcmask 1043456   ;;  %vm159_vm2 = vcmask 64512  }
   0xc   : > { %286 = vmatprep.subr.bf16.mxu0 %v310_v0  ;;  %288 = vmatprep.mubr.msk.bf16.mxu0 %vm311_vm0, %v310_v0  ;;  %s278_s11 = sshll.u32 %s351_s10, 2  ;;  %s280_s18 = sshll.u32 %s351_s10, 3 }
   0xd   : > { %s151_s14 = scalar_lea.vmem %s348_s1, %s278_s11  ;;  %s147_s17 = scalar_lea.vmem %s347_s0, %s278_s11 }
   0xe   : > { %v158_v1 = vld [vmem:[%s151_s14] sm:$0xf]  ;;  %s155_s21 = scalar_lea.vmem %s349_s2, %s280_s18 }
   0xf   : > { %v165_v2 = vsel %vm163_vm1, %v158_v1, 0  ;;  %v157_v3 = vld [vmem:[%s147_s17] sm:$0xf] }
  0x10   : > { %287 = vmatpush3.bf16.msra.mxu0 %v165_v2 }
  0x13   : > { %289 = vmatmul.mubr.msk.bf16.vlgmr.msra.gmra.mxu0 %vm159_vm2, %v157_v3 }
  0xd3   : > { %v201_v4 = vpop.f32.mrf.mxu0 }
  0xd4   : > { %207 = vst [vmem:[%s155_s21] sm:$0xff] %v201_v4 }
  0xd5   : > { %v290_v5 = vpop.f32.mrf.mxu0 }
  0xd7   : > { %v204_v6 = vpop.f32.mrf.mxu0 }
  0xd9   : > { %v291_v7 = vpop.f32.mrf.mxu0 }
  0xda PF: > { %s12_s9 = sadd.s32 1, %s308_s9  }
  0xdb   : > { %p9_p4 = scmp.ge.s32.totalorder %s12_s9, 10  }
  0xdd   :  { %11 = sbr.rel (!%p9_p4) target bundleno = 1 (0x1), region = 61 }

</bundles_post_ra>
